<compile_context>
chip_gen: v7x
topology: tpu7x:2x2x1
jax: 0.10.0
libtpu: 0.0.40
codegen_flags: <defaults>
</compile_context>

<pallas_src>
import numpy as np
import jax
import jax.numpy as jnp
from jax import lax
from jax.experimental import pallas as pl
from jax.experimental.pallas import tpu as pltpu

CIN, COUT = 4, 8
KH = KW = 3
STRIDE = 2
PAD = 1
K = KH * KW * CIN          # 36: flattened conv contraction depth
NPH = 4 * CIN              # 16: (2x2 spatial phases) x input channels

# Max lanes per tile over flattened (batch*pixels).  Per-tile VMEM is roughly
# R * (16*2*2 bf16 in dbl-buf + 16*4 f32 window + 36*4 patch + 8*4*2 out
# dbl-buf) ~= 336 B/lane ~= 11 MiB at R = 32768 -- comfortable on v5e/v6e and
# under v7x's 64 MiB-per-TC VMEM.
MAX_TILE_R = 32768


def _folded_weight(w_hwio):
    """Conv weight (HWIO) flattened to (K, COUT) with the shortcut folded in.

    AvgPool2d((2,2),(2,2)) of output pixel (i,j) reads exactly the conv taps
    (kh,kw) in {(1,1),(1,2),(2,1),(2,2)} (flattened tap ids 4,5,7,8); the
    channel zero-pad means only channels 0..CIN-1 receive the shortcut.
    """
    fold = np.zeros((K, COUT), np.float32)
    for tap in (4, 5, 7, 8):
        for c in range(CIN):
            fold[tap * CIN + c, c] = 0.25
    return jnp.asarray(fold) + w_hwio.reshape(K, COUT).astype(jnp.float32)


def _phase_decompose(xb):
    """(N, CIN, H, W) -> (N, NPH, Ho+1, Wo+1) phases of the 1-padded image.

    Phase (a, b), a,b in {0,1}, holds xpad[:, :, a::2, b::2] where xpad is x
    zero-padded by 1 on every spatial edge.  Conv tap (kh, kw) of output pixel
    (i, j) is phase (kh%2, kw%2) sampled at (i + kh//2, j + kw//2), i.e. after
    flattening each phase plane every tap is a contiguous shifted slice.
    """
    def rows(a):
        if a == 0:                     # xpad even rows = [zero row, x[1::2]]
            return jnp.pad(xb[:, :, 1::2, :], ((0, 0), (0, 0), (1, 0), (0, 0)))
        return jnp.pad(xb[:, :, 0::2, :], ((0, 0), (0, 0), (0, 1), (0, 0)))

    def cols(r, b):
        if b == 0:
            return jnp.pad(r[:, :, :, 1::2], ((0, 0), (0, 0), (0, 0), (1, 0)))
        return jnp.pad(r[:, :, :, 0::2], ((0, 0), (0, 0), (0, 0), (0, 1)))

    phases = [cols(rows(a), b) for a in (0, 1) for b in (0, 1)]
    ph = jnp.stack(phases, axis=1)                  # (N, 4, CIN, Ho+1, Wo+1)
    n = xb.shape[0]
    return ph.reshape(n, NPH, ph.shape[-2], ph.shape[-1])


def residual_adapter(x_nchw, w_hwio, bias):
    N, C, H, W = x_nchw.shape
    assert C == CIN and H % 2 == 0 and W % 2 == 0
    # TODO(synk): AvgPool2d ceil_mode=True behavior for odd H/W is not covered.
    Ho, Wo = H // STRIDE, W // STRIDE
    L = (Ho + 1) * (Wo + 1)      # flat pixel pitch per image (1 junk row/col)
    HALO = Wo + 2                # largest tap offset + 1
    T0 = N * L                   # total flattened pixels carrying real data

    # Tile the single flattened (batch*pixels) lane axis.
    n_tiles = (T0 + MAX_TILE_R - 1) // MAX_TILE_R
    R = (((T0 + n_tiles - 1) // n_tiles) + 127) // 128 * 128
    T = n_tiles * R
    assert HALO < R

    # Phase-decomposed bf16 activations, flattened to (NPH, (n_tiles+1)*R).
    xb = x_nchw.astype(jnp.bfloat16)
    ph = _phase_decompose(xb)                              # (N, NPH, Ho+1, Wo+1)
    phi = jnp.transpose(ph, (1, 0, 2, 3)).reshape(NPH, T0)
    phi = jnp.pad(phi, ((0, 0), (0, (n_tiles + 1) * R - T0)))
    # Per-tile halo strip: phi[:, (t+1)*R : (t+1)*R + HALO]   (tiny array).
    strips = jnp.transpose(
        phi.reshape(NPH, n_tiles + 1, R)[:, 1:, :HALO], (1, 0, 2))

    wt = _folded_weight(w_hwio).T                          # (COUT, K) f32
    b2d = bias.reshape(COUT, 1).astype(jnp.float32)

    def kernel(p_ref, s_ref, wt_ref, b_ref, o_ref, win_ref, halo_ref, patch_ref):
        # p_ref  : (NPH, R)       bf16 phase block (flat pixels on lanes)
        # s_ref  : (1, NPH, HALO) bf16 halo strip for this tile
        # wt_ref : (COUT, K)      f32 conv weight^T with folded shortcut
        # b_ref  : (COUT, 1)      f32 conv bias
        # o_ref  : (COUT, R)      f32 lane-dense output tile
        # Upcast the bf16 stream once; all later slicing is plain f32.
        win_ref[...] = p_ref[...].astype(jnp.float32)
        halo_ref[...] = s_ref[0].astype(jnp.float32)
        # In-VMEM im2col: each tap row is a contiguous (shifted) lane slice.
        for kh in range(KH):
            for kw in range(KW):
                a, dh = kh % 2, kh // 2
                b, dw = kw % 2, kw // 2
                off = dh * (Wo + 1) + dw
                for c in range(CIN):
                    k = (kh * KW + kw) * CIN + c
                    ch = (a * 2 + b) * CIN + c
                    if off == 0:
                        patch_ref[k:k + 1, :] = win_ref[ch:ch + 1, :]
                    else:
                        patch_ref[k:k + 1, :R - off] = win_ref[ch:ch + 1, off:R]
                        patch_ref[k:k + 1, R - off:] = halo_ref[ch:ch + 1, :off]
        acc = jnp.dot(wt_ref[...], patch_ref[...],
                      preferred_element_type=jnp.float32)  # (COUT, R) on MXU
        o_ref[...] = jnp.maximum(acc + b_ref[...], 0.0).astype(o_ref.dtype)

    out_flat = pl.pallas_call(
        kernel,
        out_shape=jax.ShapeDtypeStruct((COUT, T), jnp.float32),
        grid=(n_tiles,),
        in_specs=[
            pl.BlockSpec((NPH, R), lambda t: (0, t)),
            pl.BlockSpec((1, NPH, HALO), lambda t: (t, 0, 0)),
            pl.BlockSpec((COUT, K), lambda t: (0, 0)),
            pl.BlockSpec((COUT, 1), lambda t: (0, 0)),
        ],
        out_specs=pl.BlockSpec((COUT, R), lambda t: (0, t)),
        scratch_shapes=[
            pltpu.VMEM((NPH, R), jnp.float32),     # upcast phase window
            pltpu.VMEM((NPH, HALO), jnp.float32),  # upcast halo strip
            pltpu.VMEM((K, R), jnp.float32),       # im2col patch slab
        ],
        compiler_params=pltpu.CompilerParams(
            dimension_semantics=("parallel",),
            vmem_limit_bytes=48 * 1024 * 1024),
    )(phi, strips, wt, b2d)

    # Drop the junk row/column of each image and return NCHW.
    # TODO(synk): a consumer that accepts the flat (COUT, pixels) layout could
    # skip this final HBM pass entirely.
    out = out_flat[:, :T0].reshape(COUT, N, Ho + 1, Wo + 1)[:, :, :Ho, :Wo]
    return jnp.transpose(out, (1, 0, 2, 3))


def residual_adapter_reference(x_nchw, w_hwio, bias):
    """Pure-JAX f32 reference matching the PyTorch forward semantics."""
    x = jnp.transpose(x_nchw, (0, 2, 3, 1)).astype(jnp.float32)
    conv = lax.conv_general_dilated(
        x, w_hwio.astype(jnp.float32),
        window_strides=(STRIDE, STRIDE),
        padding=((PAD, PAD), (PAD, PAD)),
        dimension_numbers=("NHWC", "HWIO", "NHWC"))
    conv = conv + bias.reshape(1, 1, 1, COUT)
    N, Ho, Wo, _ = conv.shape
    shortcut = x.reshape(N, Ho, 2, Wo, 2, CIN).mean(axis=(2, 4))
    shortcut = jnp.pad(shortcut, ((0, 0), (0, 0), (0, 0), (0, COUT - CIN)))
    out = jnp.maximum(conv + shortcut, 0.0)
    return jnp.transpose(out, (0, 3, 1, 2))


if __name__ == "__main__":
    key = jax.random.PRNGKey(0)
    kx, kw, kb = jax.random.split(key, 3)

    # Deterministic synthetic parameters / input (small shapes).
    x_nchw = jax.random.normal(kx, (2, CIN, 16, 16), jnp.float32)
    w_hwio = jax.random.normal(kw, (KH, KW, CIN, COUT), jnp.float32) * 0.1
    bias = jax.random.normal(kb, (COUT,), jnp.float32) * 0.1

    out = residual_adapter(x_nchw, w_hwio, bias)
    out = jax.block_until_ready(out)

    ref = residual_adapter_reference(x_nchw, w_hwio, bias)
    assert out.shape == ref.shape == (2, COUT, 8, 8), out.shape
    # Activations are streamed to the kernel in bf16 (accumulation stays f32),
    # so compare against the f32 reference with a correspondingly loose tol.
    max_err = float(jnp.max(jnp.abs(out - ref)))
    assert jnp.allclose(out, ref, atol=5e-2, rtol=5e-2), max_err

    print("KERNEL_OK")
</pallas_src>

<mosaic_0001>
module attributes {stable_mosaic.version = 11 : i64} {
  func.func @kernel(%arg0: i32, %arg1: memref<16x256xbf16, #tpu.memory_space<vmem>>, %arg2: memref<1x16x10xbf16, #tpu.memory_space<vmem>>, %arg3: memref<8x36xf32, #tpu.memory_space<vmem>>, %arg4: memref<8x1xf32, #tpu.memory_space<vmem>>, %arg5: memref<8x256xf32, #tpu.memory_space<vmem>>, %arg6: memref<16x256xf32, #tpu.memory_space<vmem>>, %arg7: memref<16x10xf32, #tpu.memory_space<vmem>>, %arg8: memref<36x256xf32, #tpu.memory_space<vmem>>) attributes {dimension_semantics = [#tpu.dimension_semantics<parallel>], iteration_bounds = array<i64: 1>, scalar_prefetch = 0 : i64, scratch_operands = 3 : i64, tpu.core_type = #tpu.core_type<tc>, window_params = [{transform_indices = @transform_0, window_bounds = array<i64: 16, 256>}, {transform_indices = @transform_1, window_bounds = array<i64: 1, 16, 10>}, {pipeline_mode = #tpu.pipeline_mode<synchronous>, transform_indices = @transform_2, window_bounds = array<i64: 8, 36>}, {pipeline_mode = #tpu.pipeline_mode<synchronous>, transform_indices = @transform_3, window_bounds = array<i64: 8, 1>}, {transform_indices = @transform_4, window_bounds = array<i64: 8, 256>}]} {
    %c0 = arith.constant 0 : index
    %c0_0 = arith.constant 0 : index
    %0 = vector.load %arg1[%c0, %c0_0] : memref<16x256xbf16, #tpu.memory_space<vmem>>, vector<16x256xbf16>
    %1 = arith.extf %0 : vector<16x256xbf16> to vector<16x256xf32>
    %c0_1 = arith.constant 0 : index
    %c0_2 = arith.constant 0 : index
    %2 = vector.load %arg6[%c0_1, %c0_2] : memref<16x256xf32, #tpu.memory_space<vmem>>, vector<16x256xf32>
    tpu.vector_store %arg6[%c0_1, %c0_2], %1 {strides = array<i32>} : memref<16x256xf32, #tpu.memory_space<vmem>>, vector<16x256xf32>,
    %c0_3 = arith.constant 0 : index
    %c0_4 = arith.constant 0 : index
    %c0_5 = arith.constant 0 : index
    %3 = vector.load %arg2[%c0_3, %c0_4, %c0_5] : memref<1x16x10xbf16, #tpu.memory_space<vmem>>, vector<1x16x10xbf16>
    %4 = vector.shape_cast %3 : vector<1x16x10xbf16> to vector<16x10xbf16>
    %5 = arith.extf %4 : vector<16x10xbf16> to vector<16x10xf32>
    %c0_6 = arith.constant 0 : index
    %c0_7 = arith.constant 0 : index
    %6 = vector.load %arg7[%c0_6, %c0_7] : memref<16x10xf32, #tpu.memory_space<vmem>>, vector<16x10xf32>
    tpu.vector_store %arg7[%c0_6, %c0_7], %5 {strides = array<i32>} : memref<16x10xf32, #tpu.memory_space<vmem>>, vector<16x10xf32>,
    %c0_8 = arith.constant 0 : index
    %c0_9 = arith.constant 0 : index
    %7 = vector.load %arg6[%c0_8, %c0_9] : memref<16x256xf32, #tpu.memory_space<vmem>>, vector<1x256xf32>
    %c0_10 = arith.constant 0 : index
    %c0_11 = arith.constant 0 : index
    %8 = vector.load %arg8[%c0_10, %c0_11] : memref<36x256xf32, #tpu.memory_space<vmem>>, vector<1x256xf32>
    tpu.vector_store %arg8[%c0_10, %c0_11], %7 {strides = array<i32>} : memref<36x256xf32, #tpu.memory_space<vmem>>, vector<1x256xf32>,
    %c1 = arith.constant 1 : index
    %c0_12 = arith.constant 0 : index
    %9 = vector.load %arg6[%c1, %c0_12] : memref<16x256xf32, #tpu.memory_space<vmem>>, vector<1x256xf32>
    %c1_13 = arith.constant 1 : index
    %c0_14 = arith.constant 0 : index
    %10 = vector.load %arg8[%c1_13, %c0_14] : memref<36x256xf32, #tpu.memory_space<vmem>>, vector<1x256xf32>
    tpu.vector_store %arg8[%c1_13, %c0_14], %9 {strides = array<i32>} : memref<36x256xf32, #tpu.memory_space<vmem>>, vector<1x256xf32>,
    %c2 = arith.constant 2 : index
    %c0_15 = arith.constant 0 : index
    %11 = vector.load %arg6[%c2, %c0_15] : memref<16x256xf32, #tpu.memory_space<vmem>>, vector<1x256xf32>
    %c2_16 = arith.constant 2 : index
    %c0_17 = arith.constant 0 : index
    %12 = vector.load %arg8[%c2_16, %c0_17] : memref<36x256xf32, #tpu.memory_space<vmem>>, vector<1x256xf32>
    tpu.vector_store %arg8[%c2_16, %c0_17], %11 {strides = array<i32>} : memref<36x256xf32, #tpu.memory_space<vmem>>, vector<1x256xf32>,
    %c3 = arith.constant 3 : index
    %c0_18 = arith.constant 0 : index
    %13 = vector.load %arg6[%c3, %c0_18] : memref<16x256xf32, #tpu.memory_space<vmem>>, vector<1x256xf32>
    %c3_19 = arith.constant 3 : index
    %c0_20 = arith.constant 0 : index
    %14 = vector.load %arg8[%c3_19, %c0_20] : memref<36x256xf32, #tpu.memory_space<vmem>>, vector<1x256xf32>
    tpu.vector_store %arg8[%c3_19, %c0_20], %13 {strides = array<i32>} : memref<36x256xf32, #tpu.memory_space<vmem>>, vector<1x256xf32>,
    %c4 = arith.constant 4 : index
    %c0_21 = arith.constant 0 : index
    %15 = vector.load %arg6[%c4, %c0_21] : memref<16x256xf32, #tpu.memory_space<vmem>>, vector<1x256xf32>
    %c4_22 = arith.constant 4 : index
    %c0_23 = arith.constant 0 : index
    %16 = vector.load %arg8[%c4_22, %c0_23] : memref<36x256xf32, #tpu.memory_space<vmem>>, vector<1x256xf32>
    tpu.vector_store %arg8[%c4_22, %c0_23], %15 {strides = array<i32>} : memref<36x256xf32, #tpu.memory_space<vmem>>, vector<1x256xf32>,
    %c5 = arith.constant 5 : index
    %c0_24 = arith.constant 0 : index
    %17 = vector.load %arg6[%c5, %c0_24] : memref<16x256xf32, #tpu.memory_space<vmem>>, vector<1x256xf32>
    %c5_25 = arith.constant 5 : index
    %c0_26 = arith.constant 0 : index
    %18 = vector.load %arg8[%c5_25, %c0_26] : memref<36x256xf32, #tpu.memory_space<vmem>>, vector<1x256xf32>
    tpu.vector_store %arg8[%c5_25, %c0_26], %17 {strides = array<i32>} : memref<36x256xf32, #tpu.memory_space<vmem>>, vector<1x256xf32>,
    %c6 = arith.constant 6 : index
    %c0_27 = arith.constant 0 : index
    %19 = vector.load %arg6[%c6, %c0_27] : memref<16x256xf32, #tpu.memory_space<vmem>>, vector<1x256xf32>
    %c6_28 = arith.constant 6 : index
    %c0_29 = arith.constant 0 : index
    %20 = vector.load %arg8[%c6_28, %c0_29] : memref<36x256xf32, #tpu.memory_space<vmem>>, vector<1x256xf32>
    tpu.vector_store %arg8[%c6_28, %c0_29], %19 {strides = array<i32>} : memref<36x256xf32, #tpu.memory_space<vmem>>, vector<1x256xf32>,
    %c7 = arith.constant 7 : index
    %c0_30 = arith.constant 0 : index
    %21 = vector.load %arg6[%c7, %c0_30] : memref<16x256xf32, #tpu.memory_space<vmem>>, vector<1x256xf32>
    %c7_31 = arith.constant 7 : index
    %c0_32 = arith.constant 0 : index
    %22 = vector.load %arg8[%c7_31, %c0_32] : memref<36x256xf32, #tpu.memory_space<vmem>>, vector<1x256xf32>
    tpu.vector_store %arg8[%c7_31, %c0_32], %21 {strides = array<i32>} : memref<36x256xf32, #tpu.memory_space<vmem>>, vector<1x256xf32>,
    %c0_33 = arith.constant 0 : index
    %c1_34 = arith.constant 1 : index
    %23 = vector.load %arg6[%c0_33, %c1_34] : memref<16x256xf32, #tpu.memory_space<vmem>>, vector<1x255xf32>
    %c8 = arith.constant 8 : index
    %c0_35 = arith.constant 0 : index
    %24 = vector.load %arg8[%c8, %c0_35] : memref<36x256xf32, #tpu.memory_space<vmem>>, vector<1x255xf32>
    tpu.vector_store %arg8[%c8, %c0_35], %23 {strides = array<i32>} : memref<36x256xf32, #tpu.memory_space<vmem>>, vector<1x255xf32>,
    %c0_36 = arith.constant 0 : index
    %c0_37 = arith.constant 0 : index
    %25 = vector.load %arg7[%c0_36, %c0_37] : memref<16x10xf32, #tpu.memory_space<vmem>>, vector<1x1xf32>
    %c8_38 = arith.constant 8 : index
    %c255 = arith.constant 255 : index
    %26 = vector.load %arg8[%c8_38, %c255] : memref<36x256xf32, #tpu.memory_space<vmem>>, vector<1x1xf32>
    tpu.vector_store %arg8[%c8_38, %c255], %25 {strides = array<i32>} : memref<36x256xf32, #tpu.memory_space<vmem>>, vector<1x1xf32>,
    %c1_39 = arith.constant 1 : index
    %c1_40 = arith.constant 1 : index
    %27 = vector.load %arg6[%c1_39, %c1_40] : memref<16x256xf32, #tpu.memory_space<vmem>>, vector<1x255xf32>
    %c9 = arith.constant 9 : index
    %c0_41 = arith.constant 0 : index
    %28 = vector.load %arg8[%c9, %c0_41] : memref<36x256xf32, #tpu.memory_space<vmem>>, vector<1x255xf32>
    tpu.vector_store %arg8[%c9, %c0_41], %27 {strides = array<i32>} : memref<36x256xf32, #tpu.memory_space<vmem>>, vector<1x255xf32>,
    %c1_42 = arith.constant 1 : index
    %c0_43 = arith.constant 0 : index
    %29 = vector.load %arg7[%c1_42, %c0_43] : memref<16x10xf32, #tpu.memory_space<vmem>>, vector<1x1xf32>
    %c9_44 = arith.constant 9 : index
    %c255_45 = arith.constant 255 : index
    %30 = vector.load %arg8[%c9_44, %c255_45] : memref<36x256xf32, #tpu.memory_space<vmem>>, vector<1x1xf32>
    tpu.vector_store %arg8[%c9_44, %c255_45], %29 {strides = array<i32>} : memref<36x256xf32, #tpu.memory_space<vmem>>, vector<1x1xf32>,
    %c2_46 = arith.constant 2 : index
    %c1_47 = arith.constant 1 : index
    %31 = vector.load %arg6[%c2_46, %c1_47] : memref<16x256xf32, #tpu.memory_space<vmem>>, vector<1x255xf32>
    %c10 = arith.constant 10 : index
    %c0_48 = arith.constant 0 : index
    %32 = vector.load %arg8[%c10, %c0_48] : memref<36x256xf32, #tpu.memory_space<vmem>>, vector<1x255xf32>
    tpu.vector_store %arg8[%c10, %c0_48], %31 {strides = array<i32>} : memref<36x256xf32, #tpu.memory_space<vmem>>, vector<1x255xf32>,
    %c2_49 = arith.constant 2 : index
    %c0_50 = arith.constant 0 : index
    %33 = vector.load %arg7[%c2_49, %c0_50] : memref<16x10xf32, #tpu.memory_space<vmem>>, vector<1x1xf32>
    %c10_51 = arith.constant 10 : index
    %c255_52 = arith.constant 255 : index
    %34 = vector.load %arg8[%c10_51, %c255_52] : memref<36x256xf32, #tpu.memory_space<vmem>>, vector<1x1xf32>
    tpu.vector_store %arg8[%c10_51, %c255_52], %33 {strides = array<i32>} : memref<36x256xf32, #tpu.memory_space<vmem>>, vector<1x1xf32>,
    %c3_53 = arith.constant 3 : index
    %c1_54 = arith.constant 1 : index
    %35 = vector.load %arg6[%c3_53, %c1_54] : memref<16x256xf32, #tpu.memory_space<vmem>>, vector<1x255xf32>
    %c11 = arith.constant 11 : index
    %c0_55 = arith.constant 0 : index
    %36 = vector.load %arg8[%c11, %c0_55] : memref<36x256xf32, #tpu.memory_space<vmem>>, vector<1x255xf32>
    tpu.vector_store %arg8[%c11, %c0_55], %35 {strides = array<i32>} : memref<36x256xf32, #tpu.memory_space<vmem>>, vector<1x255xf32>,
    %c3_56 = arith.constant 3 : index
    %c0_57 = arith.constant 0 : index
    %37 = vector.load %arg7[%c3_56, %c0_57] : memref<16x10xf32, #tpu.memory_space<vmem>>, vector<1x1xf32>
    %c11_58 = arith.constant 11 : index
    %c255_59 = arith.constant 255 : index
    %38 = vector.load %arg8[%c11_58, %c255_59] : memref<36x256xf32, #tpu.memory_space<vmem>>, vector<1x1xf32>
    tpu.vector_store %arg8[%c11_58, %c255_59], %37 {strides = array<i32>} : memref<36x256xf32, #tpu.memory_space<vmem>>, vector<1x1xf32>,
    %c8_60 = arith.constant 8 : index
    %c0_61 = arith.constant 0 : index
    %39 = vector.load %arg6[%c8_60, %c0_61] : memref<16x256xf32, #tpu.memory_space<vmem>>, vector<1x256xf32>
    %c12 = arith.constant 12 : index
    %c0_62 = arith.constant 0 : index
    %40 = vector.load %arg8[%c12, %c0_62] : memref<36x256xf32, #tpu.memory_space<vmem>>, vector<1x256xf32>
    tpu.vector_store %arg8[%c12, %c0_62], %39 {strides = array<i32>} : memref<36x256xf32, #tpu.memory_space<vmem>>, vector<1x256xf32>,
    %c9_63 = arith.constant 9 : index
    %c0_64 = arith.constant 0 : index
    %41 = vector.load %arg6[%c9_63, %c0_64] : memref<16x256xf32, #tpu.memory_space<vmem>>, vector<1x256xf32>
    %c13 = arith.constant 13 : index
    %c0_65 = arith.constant 0 : index
    %42 = vector.load %arg8[%c13, %c0_65] : memref<36x256xf32, #tpu.memory_space<vmem>>, vector<1x256xf32>
    tpu.vector_store %arg8[%c13, %c0_65], %41 {strides = array<i32>} : memref<36x256xf32, #tpu.memory_space<vmem>>, vector<1x256xf32>,
    %c10_66 = arith.constant 10 : index
    %c0_67 = arith.constant 0 : index
    %43 = vector.load %arg6[%c10_66, %c0_67] : memref<16x256xf32, #tpu.memory_space<vmem>>, vector<1x256xf32>
    %c14 = arith.constant 14 : index
    %c0_68 = arith.constant 0 : index
    %44 = vector.load %arg8[%c14, %c0_68] : memref<36x256xf32, #tpu.memory_space<vmem>>, vector<1x256xf32>
    tpu.vector_store %arg8[%c14, %c0_68], %43 {strides = array<i32>} : memref<36x256xf32, #tpu.memory_space<vmem>>, vector<1x256xf32>,
    %c11_69 = arith.constant 11 : index
    %c0_70 = arith.constant 0 : index
    %45 = vector.load %arg6[%c11_69, %c0_70] : memref<16x256xf32, #tpu.memory_space<vmem>>, vector<1x256xf32>
    %c15 = arith.constant 15 : index
    %c0_71 = arith.constant 0 : index
    %46 = vector.load %arg8[%c15, %c0_71] : memref<36x256xf32, #tpu.memory_space<vmem>>, vector<1x256xf32>
    tpu.vector_store %arg8[%c15, %c0_71], %45 {strides = array<i32>} : memref<36x256xf32, #tpu.memory_space<vmem>>, vector<1x256xf32>,
    %c12_72 = arith.constant 12 : index
    %c0_73 = arith.constant 0 : index
    %47 = vector.load %arg6[%c12_72, %c0_73] : memref<16x256xf32, #tpu.memory_space<vmem>>, vector<1x256xf32>
    %c16 = arith.constant 16 : index
    %c0_74 = arith.constant 0 : index
    %48 = vector.load %arg8[%c16, %c0_74] : memref<36x256xf32, #tpu.memory_space<vmem>>, vector<1x256xf32>
    tpu.vector_store %arg8[%c16, %c0_74], %47 {strides = array<i32>} : memref<36x256xf32, #tpu.memory_space<vmem>>, vector<1x256xf32>,
    %c13_75 = arith.constant 13 : index
    %c0_76 = arith.constant 0 : index
    %49 = vector.load %arg6[%c13_75, %c0_76] : memref<16x256xf32, #tpu.memory_space<vmem>>, vector<1x256xf32>
    %c17 = arith.constant 17 : index
    %c0_77 = arith.constant 0 : index
    %50 = vector.load %arg8[%c17, %c0_77] : memref<36x256xf32, #tpu.memory_space<vmem>>, vector<1x256xf32>
    tpu.vector_store %arg8[%c17, %c0_77], %49 {strides = array<i32>} : memref<36x256xf32, #tpu.memory_space<vmem>>, vector<1x256xf32>,
    %c14_78 = arith.constant 14 : index
    %c0_79 = arith.constant 0 : index
    %51 = vector.load %arg6[%c14_78, %c0_79] : memref<16x256xf32, #tpu.memory_space<vmem>>, vector<1x256xf32>
    %c18 = arith.constant 18 : index
    %c0_80 = arith.constant 0 : index
    %52 = vector.load %arg8[%c18, %c0_80] : memref<36x256xf32, #tpu.memory_space<vmem>>, vector<1x256xf32>
    tpu.vector_store %arg8[%c18, %c0_80], %51 {strides = array<i32>} : memref<36x256xf32, #tpu.memory_space<vmem>>, vector<1x256xf32>,
    %c15_81 = arith.constant 15 : index
    %c0_82 = arith.constant 0 : index
    %53 = vector.load %arg6[%c15_81, %c0_82] : memref<16x256xf32, #tpu.memory_space<vmem>>, vector<1x256xf32>
    %c19 = arith.constant 19 : index
    %c0_83 = arith.constant 0 : index
    %54 = vector.load %arg8[%c19, %c0_83] : memref<36x256xf32, #tpu.memory_space<vmem>>, vector<1x256xf32>
    tpu.vector_store %arg8[%c19, %c0_83], %53 {strides = array<i32>} : memref<36x256xf32, #tpu.memory_space<vmem>>, vector<1x256xf32>,
    %c8_84 = arith.constant 8 : index
    %c1_85 = arith.constant 1 : index
    %55 = vector.load %arg6[%c8_84, %c1_85] : memref<16x256xf32, #tpu.memory_space<vmem>>, vector<1x255xf32>
    %c20 = arith.constant 20 : index
    %c0_86 = arith.constant 0 : index
    %56 = vector.load %arg8[%c20, %c0_86] : memref<36x256xf32, #tpu.memory_space<vmem>>, vector<1x255xf32>
    tpu.vector_store %arg8[%c20, %c0_86], %55 {strides = array<i32>} : memref<36x256xf32, #tpu.memory_space<vmem>>, vector<1x255xf32>,
    %c8_87 = arith.constant 8 : index
    %c0_88 = arith.constant 0 : index
    %57 = vector.load %arg7[%c8_87, %c0_88] : memref<16x10xf32, #tpu.memory_space<vmem>>, vector<1x1xf32>
    %c20_89 = arith.constant 20 : index
    %c255_90 = arith.constant 255 : index
    %58 = vector.load %arg8[%c20_89, %c255_90] : memref<36x256xf32, #tpu.memory_space<vmem>>, vector<1x1xf32>
    tpu.vector_store %arg8[%c20_89, %c255_90], %57 {strides = array<i32>} : memref<36x256xf32, #tpu.memory_space<vmem>>, vector<1x1xf32>,
    %c9_91 = arith.constant 9 : index
    %c1_92 = arith.constant 1 : index
    %59 = vector.load %arg6[%c9_91, %c1_92] : memref<16x256xf32, #tpu.memory_space<vmem>>, vector<1x255xf32>
    %c21 = arith.constant 21 : index
    %c0_93 = arith.constant 0 : index
    %60 = vector.load %arg8[%c21, %c0_93] : memref<36x256xf32, #tpu.memory_space<vmem>>, vector<1x255xf32>
    tpu.vector_store %arg8[%c21, %c0_93], %59 {strides = array<i32>} : memref<36x256xf32, #tpu.memory_space<vmem>>, vector<1x255xf32>,
    %c9_94 = arith.constant 9 : index
    %c0_95 = arith.constant 0 : index
    %61 = vector.load %arg7[%c9_94, %c0_95] : memref<16x10xf32, #tpu.memory_space<vmem>>, vector<1x1xf32>
    %c21_96 = arith.constant 21 : index
    %c255_97 = arith.constant 255 : index
    %62 = vector.load %arg8[%c21_96, %c255_97] : memref<36x256xf32, #tpu.memory_space<vmem>>, vector<1x1xf32>
    tpu.vector_store %arg8[%c21_96, %c255_97], %61 {strides = array<i32>} : memref<36x256xf32, #tpu.memory_space<vmem>>, vector<1x1xf32>,
    %c10_98 = arith.constant 10 : index
    %c1_99 = arith.constant 1 : index
    %63 = vector.load %arg6[%c10_98, %c1_99] : memref<16x256xf32, #tpu.memory_space<vmem>>, vector<1x255xf32>
    %c22 = arith.constant 22 : index
    %c0_100 = arith.constant 0 : index
    %64 = vector.load %arg8[%c22, %c0_100] : memref<36x256xf32, #tpu.memory_space<vmem>>, vector<1x255xf32>
    tpu.vector_store %arg8[%c22, %c0_100], %63 {strides = array<i32>} : memref<36x256xf32, #tpu.memory_space<vmem>>, vector<1x255xf32>,
    %c10_101 = arith.constant 10 : index
    %c0_102 = arith.constant 0 : index
    %65 = vector.load %arg7[%c10_101, %c0_102] : memref<16x10xf32, #tpu.memory_space<vmem>>, vector<1x1xf32>
    %c22_103 = arith.constant 22 : index
    %c255_104 = arith.constant 255 : index
    %66 = vector.load %arg8[%c22_103, %c255_104] : memref<36x256xf32, #tpu.memory_space<vmem>>, vector<1x1xf32>
    tpu.vector_store %arg8[%c22_103, %c255_104], %65 {strides = array<i32>} : memref<36x256xf32, #tpu.memory_space<vmem>>, vector<1x1xf32>,
    %c11_105 = arith.constant 11 : index
    %c1_106 = arith.constant 1 : index
    %67 = vector.load %arg6[%c11_105, %c1_106] : memref<16x256xf32, #tpu.memory_space<vmem>>, vector<1x255xf32>
    %c23 = arith.constant 23 : index
    %c0_107 = arith.constant 0 : index
    %68 = vector.load %arg8[%c23, %c0_107] : memref<36x256xf32, #tpu.memory_space<vmem>>, vector<1x255xf32>
    tpu.vector_store %arg8[%c23, %c0_107], %67 {strides = array<i32>} : memref<36x256xf32, #tpu.memory_space<vmem>>, vector<1x255xf32>,
    %c11_108 = arith.constant 11 : index
    %c0_109 = arith.constant 0 : index
    %69 = vector.load %arg7[%c11_108, %c0_109] : memref<16x10xf32, #tpu.memory_space<vmem>>, vector<1x1xf32>
    %c23_110 = arith.constant 23 : index
    %c255_111 = arith.constant 255 : index
    %70 = vector.load %arg8[%c23_110, %c255_111] : memref<36x256xf32, #tpu.memory_space<vmem>>, vector<1x1xf32>
    tpu.vector_store %arg8[%c23_110, %c255_111], %69 {strides = array<i32>} : memref<36x256xf32, #tpu.memory_space<vmem>>, vector<1x1xf32>,
    %c0_112 = arith.constant 0 : index
    %c9_113 = arith.constant 9 : index
    %71 = vector.load %arg6[%c0_112, %c9_113] : memref<16x256xf32, #tpu.memory_space<vmem>>, vector<1x247xf32>
    %c24 = arith.constant 24 : index
    %c0_114 = arith.constant 0 : index
    %72 = vector.load %arg8[%c24, %c0_114] : memref<36x256xf32, #tpu.memory_space<vmem>>, vector<1x247xf32>
    tpu.vector_store %arg8[%c24, %c0_114], %71 {strides = array<i32>} : memref<36x256xf32, #tpu.memory_space<vmem>>, vector<1x247xf32>,
    %c0_115 = arith.constant 0 : index
    %c0_116 = arith.constant 0 : index
    %73 = vector.load %arg7[%c0_115, %c0_116] : memref<16x10xf32, #tpu.memory_space<vmem>>, vector<1x9xf32>
    %c24_117 = arith.constant 24 : index
    %c247 = arith.constant 247 : index
    %74 = vector.load %arg8[%c24_117, %c247] : memref<36x256xf32, #tpu.memory_space<vmem>>, vector<1x9xf32>
    tpu.vector_store %arg8[%c24_117, %c247], %73 {strides = array<i32>} : memref<36x256xf32, #tpu.memory_space<vmem>>, vector<1x9xf32>,
    %c1_118 = arith.constant 1 : index
    %c9_119 = arith.constant 9 : index
    %75 = vector.load %arg6[%c1_118, %c9_119] : memref<16x256xf32, #tpu.memory_space<vmem>>, vector<1x247xf32>
    %c25 = arith.constant 25 : index
    %c0_120 = arith.constant 0 : index
    %76 = vector.load %arg8[%c25, %c0_120] : memref<36x256xf32, #tpu.memory_space<vmem>>, vector<1x247xf32>
    tpu.vector_store %arg8[%c25, %c0_120], %75 {strides = array<i32>} : memref<36x256xf32, #tpu.memory_space<vmem>>, vector<1x247xf32>,
    %c1_121 = arith.constant 1 : index
    %c0_122 = arith.constant 0 : index
    %77 = vector.load %arg7[%c1_121, %c0_122] : memref<16x10xf32, #tpu.memory_space<vmem>>, vector<1x9xf32>
    %c25_123 = arith.constant 25 : index
    %c247_124 = arith.constant 247 : index
    %78 = vector.load %arg8[%c25_123, %c247_124] : memref<36x256xf32, #tpu.memory_space<vmem>>, vector<1x9xf32>
    tpu.vector_store %arg8[%c25_123, %c247_124], %77 {strides = array<i32>} : memref<36x256xf32, #tpu.memory_space<vmem>>, vector<1x9xf32>,
    %c2_125 = arith.constant 2 : index
    %c9_126 = arith.constant 9 : index
    %79 = vector.load %arg6[%c2_125, %c9_126] : memref<16x256xf32, #tpu.memory_space<vmem>>, vector<1x247xf32>
    %c26 = arith.constant 26 : index
    %c0_127 = arith.constant 0 : index
    %80 = vector.load %arg8[%c26, %c0_127] : memref<36x256xf32, #tpu.memory_space<vmem>>, vector<1x247xf32>
    tpu.vector_store %arg8[%c26, %c0_127], %79 {strides = array<i32>} : memref<36x256xf32, #tpu.memory_space<vmem>>, vector<1x247xf32>,
    %c2_128 = arith.constant 2 : index
    %c0_129 = arith.constant 0 : index
    %81 = vector.load %arg7[%c2_128, %c0_129] : memref<16x10xf32, #tpu.memory_space<vmem>>, vector<1x9xf32>
    %c26_130 = arith.constant 26 : index
    %c247_131 = arith.constant 247 : index
    %82 = vector.load %arg8[%c26_130, %c247_131] : memref<36x256xf32, #tpu.memory_space<vmem>>, vector<1x9xf32>
    tpu.vector_store %arg8[%c26_130, %c247_131], %81 {strides = array<i32>} : memref<36x256xf32, #tpu.memory_space<vmem>>, vector<1x9xf32>,
    %c3_132 = arith.constant 3 : index
    %c9_133 = arith.constant 9 : index
    %83 = vector.load %arg6[%c3_132, %c9_133] : memref<16x256xf32, #tpu.memory_space<vmem>>, vector<1x247xf32>
    %c27 = arith.constant 27 : index
    %c0_134 = arith.constant 0 : index
    %84 = vector.load %arg8[%c27, %c0_134] : memref<36x256xf32, #tpu.memory_space<vmem>>, vector<1x247xf32>
    tpu.vector_store %arg8[%c27, %c0_134], %83 {strides = array<i32>} : memref<36x256xf32, #tpu.memory_space<vmem>>, vector<1x247xf32>,
    %c3_135 = arith.constant 3 : index
    %c0_136 = arith.constant 0 : index
    %85 = vector.load %arg7[%c3_135, %c0_136] : memref<16x10xf32, #tpu.memory_space<vmem>>, vector<1x9xf32>
    %c27_137 = arith.constant 27 : index
    %c247_138 = arith.constant 247 : index
    %86 = vector.load %arg8[%c27_137, %c247_138] : memref<36x256xf32, #tpu.memory_space<vmem>>, vector<1x9xf32>
    tpu.vector_store %arg8[%c27_137, %c247_138], %85 {strides = array<i32>} : memref<36x256xf32, #tpu.memory_space<vmem>>, vector<1x9xf32>,
    %c4_139 = arith.constant 4 : index
    %c9_140 = arith.constant 9 : index
    %87 = vector.load %arg6[%c4_139, %c9_140] : memref<16x256xf32, #tpu.memory_space<vmem>>, vector<1x247xf32>
    %c28 = arith.constant 28 : index
    %c0_141 = arith.constant 0 : index
    %88 = vector.load %arg8[%c28, %c0_141] : memref<36x256xf32, #tpu.memory_space<vmem>>, vector<1x247xf32>
    tpu.vector_store %arg8[%c28, %c0_141], %87 {strides = array<i32>} : memref<36x256xf32, #tpu.memory_space<vmem>>, vector<1x247xf32>,
    %c4_142 = arith.constant 4 : index
    %c0_143 = arith.constant 0 : index
    %89 = vector.load %arg7[%c4_142, %c0_143] : memref<16x10xf32, #tpu.memory_space<vmem>>, vector<1x9xf32>
    %c28_144 = arith.constant 28 : index
    %c247_145 = arith.constant 247 : index
    %90 = vector.load %arg8[%c28_144, %c247_145] : memref<36x256xf32, #tpu.memory_space<vmem>>, vector<1x9xf32>
    tpu.vector_store %arg8[%c28_144, %c247_145], %89 {strides = array<i32>} : memref<36x256xf32, #tpu.memory_space<vmem>>, vector<1x9xf32>,
    %c5_146 = arith.constant 5 : index
    %c9_147 = arith.constant 9 : index
    %91 = vector.load %arg6[%c5_146, %c9_147] : memref<16x256xf32, #tpu.memory_space<vmem>>, vector<1x247xf32>
    %c29 = arith.constant 29 : index
    %c0_148 = arith.constant 0 : index
    %92 = vector.load %arg8[%c29, %c0_148] : memref<36x256xf32, #tpu.memory_space<vmem>>, vector<1x247xf32>
    tpu.vector_store %arg8[%c29, %c0_148], %91 {strides = array<i32>} : memref<36x256xf32, #tpu.memory_space<vmem>>, vector<1x247xf32>,
    %c5_149 = arith.constant 5 : index
    %c0_150 = arith.constant 0 : index
    %93 = vector.load %arg7[%c5_149, %c0_150] : memref<16x10xf32, #tpu.memory_space<vmem>>, vector<1x9xf32>
    %c29_151 = arith.constant 29 : index
    %c247_152 = arith.constant 247 : index
    %94 = vector.load %arg8[%c29_151, %c247_152] : memref<36x256xf32, #tpu.memory_space<vmem>>, vector<1x9xf32>
    tpu.vector_store %arg8[%c29_151, %c247_152], %93 {strides = array<i32>} : memref<36x256xf32, #tpu.memory_space<vmem>>, vector<1x9xf32>,
    %c6_153 = arith.constant 6 : index
    %c9_154 = arith.constant 9 : index
    %95 = vector.load %arg6[%c6_153, %c9_154] : memref<16x256xf32, #tpu.memory_space<vmem>>, vector<1x247xf32>
    %c30 = arith.constant 30 : index
    %c0_155 = arith.constant 0 : index
    %96 = vector.load %arg8[%c30, %c0_155] : memref<36x256xf32, #tpu.memory_space<vmem>>, vector<1x247xf32>
    tpu.vector_store %arg8[%c30, %c0_155], %95 {strides = array<i32>} : memref<36x256xf32, #tpu.memory_space<vmem>>, vector<1x247xf32>,
    %c6_156 = arith.constant 6 : index
    %c0_157 = arith.constant 0 : index
    %97 = vector.load %arg7[%c6_156, %c0_157] : memref<16x10xf32, #tpu.memory_space<vmem>>, vector<1x9xf32>
    %c30_158 = arith.constant 30 : index
    %c247_159 = arith.constant 247 : index
    %98 = vector.load %arg8[%c30_158, %c247_159] : memref<36x256xf32, #tpu.memory_space<vmem>>, vector<1x9xf32>
    tpu.vector_store %arg8[%c30_158, %c247_159], %97 {strides = array<i32>} : memref<36x256xf32, #tpu.memory_space<vmem>>, vector<1x9xf32>,
    %c7_160 = arith.constant 7 : index
    %c9_161 = arith.constant 9 : index
    %99 = vector.load %arg6[%c7_160, %c9_161] : memref<16x256xf32, #tpu.memory_space<vmem>>, vector<1x247xf32>
    %c31 = arith.constant 31 : index
    %c0_162 = arith.constant 0 : index
    %100 = vector.load %arg8[%c31, %c0_162] : memref<36x256xf32, #tpu.memory_space<vmem>>, vector<1x247xf32>
    tpu.vector_store %arg8[%c31, %c0_162], %99 {strides = array<i32>} : memref<36x256xf32, #tpu.memory_space<vmem>>, vector<1x247xf32>,
    %c7_163 = arith.constant 7 : index
    %c0_164 = arith.constant 0 : index
    %101 = vector.load %arg7[%c7_163, %c0_164] : memref<16x10xf32, #tpu.memory_space<vmem>>, vector<1x9xf32>
    %c31_165 = arith.constant 31 : index
    %c247_166 = arith.constant 247 : index
    %102 = vector.load %arg8[%c31_165, %c247_166] : memref<36x256xf32, #tpu.memory_space<vmem>>, vector<1x9xf32>
    tpu.vector_store %arg8[%c31_165, %c247_166], %101 {strides = array<i32>} : memref<36x256xf32, #tpu.memory_space<vmem>>, vector<1x9xf32>,
    %c0_167 = arith.constant 0 : index
    %c10_168 = arith.constant 10 : index
    %103 = vector.load %arg6[%c0_167, %c10_168] : memref<16x256xf32, #tpu.memory_space<vmem>>, vector<1x246xf32>
    %c32 = arith.constant 32 : index
    %c0_169 = arith.constant 0 : index
    %104 = vector.load %arg8[%c32, %c0_169] : memref<36x256xf32, #tpu.memory_space<vmem>>, vector<1x246xf32>
    tpu.vector_store %arg8[%c32, %c0_169], %103 {strides = array<i32>} : memref<36x256xf32, #tpu.memory_space<vmem>>, vector<1x246xf32>,
    %c0_170 = arith.constant 0 : index
    %c0_171 = arith.constant 0 : index
    %105 = vector.load %arg7[%c0_170, %c0_171] : memref<16x10xf32, #tpu.memory_space<vmem>>, vector<1x10xf32>
    %c32_172 = arith.constant 32 : index
    %c246 = arith.constant 246 : index
    %106 = vector.load %arg8[%c32_172, %c246] : memref<36x256xf32, #tpu.memory_space<vmem>>, vector<1x10xf32>
    tpu.vector_store %arg8[%c32_172, %c246], %105 {strides = array<i32>} : memref<36x256xf32, #tpu.memory_space<vmem>>, vector<1x10xf32>,
    %c1_173 = arith.constant 1 : index
    %c10_174 = arith.constant 10 : index
    %107 = vector.load %arg6[%c1_173, %c10_174] : memref<16x256xf32, #tpu.memory_space<vmem>>, vector<1x246xf32>
    %c33 = arith.constant 33 : index
    %c0_175 = arith.constant 0 : index
    %108 = vector.load %arg8[%c33, %c0_175] : memref<36x256xf32, #tpu.memory_space<vmem>>, vector<1x246xf32>
    tpu.vector_store %arg8[%c33, %c0_175], %107 {strides = array<i32>} : memref<36x256xf32, #tpu.memory_space<vmem>>, vector<1x246xf32>,
    %c1_176 = arith.constant 1 : index
    %c0_177 = arith.constant 0 : index
    %109 = vector.load %arg7[%c1_176, %c0_177] : memref<16x10xf32, #tpu.memory_space<vmem>>, vector<1x10xf32>
    %c33_178 = arith.constant 33 : index
    %c246_179 = arith.constant 246 : index
    %110 = vector.load %arg8[%c33_178, %c246_179] : memref<36x256xf32, #tpu.memory_space<vmem>>, vector<1x10xf32>
    tpu.vector_store %arg8[%c33_178, %c246_179], %109 {strides = array<i32>} : memref<36x256xf32, #tpu.memory_space<vmem>>, vector<1x10xf32>,
    %c2_180 = arith.constant 2 : index
    %c10_181 = arith.constant 10 : index
    %111 = vector.load %arg6[%c2_180, %c10_181] : memref<16x256xf32, #tpu.memory_space<vmem>>, vector<1x246xf32>
    %c34 = arith.constant 34 : index
    %c0_182 = arith.constant 0 : index
    %112 = vector.load %arg8[%c34, %c0_182] : memref<36x256xf32, #tpu.memory_space<vmem>>, vector<1x246xf32>
    tpu.vector_store %arg8[%c34, %c0_182], %111 {strides = array<i32>} : memref<36x256xf32, #tpu.memory_space<vmem>>, vector<1x246xf32>,
    %c2_183 = arith.constant 2 : index
    %c0_184 = arith.constant 0 : index
    %113 = vector.load %arg7[%c2_183, %c0_184] : memref<16x10xf32, #tpu.memory_space<vmem>>, vector<1x10xf32>
    %c34_185 = arith.constant 34 : index
    %c246_186 = arith.constant 246 : index
    %114 = vector.load %arg8[%c34_185, %c246_186] : memref<36x256xf32, #tpu.memory_space<vmem>>, vector<1x10xf32>
    tpu.vector_store %arg8[%c34_185, %c246_186], %113 {strides = array<i32>} : memref<36x256xf32, #tpu.memory_space<vmem>>, vector<1x10xf32>,
    %c3_187 = arith.constant 3 : index
    %c10_188 = arith.constant 10 : index
    %115 = vector.load %arg6[%c3_187, %c10_188] : memref<16x256xf32, #tpu.memory_space<vmem>>, vector<1x246xf32>
    %c35 = arith.constant 35 : index
    %c0_189 = arith.constant 0 : index
    %116 = vector.load %arg8[%c35, %c0_189] : memref<36x256xf32, #tpu.memory_space<vmem>>, vector<1x246xf32>
    tpu.vector_store %arg8[%c35, %c0_189], %115 {strides = array<i32>} : memref<36x256xf32, #tpu.memory_space<vmem>>, vector<1x246xf32>,
    %c3_190 = arith.constant 3 : index
    %c0_191 = arith.constant 0 : index
    %117 = vector.load %arg7[%c3_190, %c0_191] : memref<16x10xf32, #tpu.memory_space<vmem>>, vector<1x10xf32>
    %c35_192 = arith.constant 35 : index
    %c246_193 = arith.constant 246 : index
    %118 = vector.load %arg8[%c35_192, %c246_193] : memref<36x256xf32, #tpu.memory_space<vmem>>, vector<1x10xf32>
    tpu.vector_store %arg8[%c35_192, %c246_193], %117 {strides = array<i32>} : memref<36x256xf32, #tpu.memory_space<vmem>>, vector<1x10xf32>,
    %c0_194 = arith.constant 0 : index
    %c0_195 = arith.constant 0 : index
    %119 = vector.load %arg3[%c0_194, %c0_195] : memref<8x36xf32, #tpu.memory_space<vmem>>, vector<8x36xf32>
    %c0_196 = arith.constant 0 : index
    %c0_197 = arith.constant 0 : index
    %120 = vector.load %arg8[%c0_196, %c0_197] : memref<36x256xf32, #tpu.memory_space<vmem>>, vector<36x256xf32>
    %cst = arith.constant dense<0.000000e+00> : vector<8x256xf32>
    %121 = tpu.matmul %119, %120, %cst {dimension_numbers = #tpu.dot_dimension_numbers<[1], [0], [0], [1], [0, 0, 1, 1], [], []>} : vector<8x36xf32>, vector<36x256xf32>, vector<8x256xf32> -> vector<8x256xf32>
    %c0_198 = arith.constant 0 : index
    %c0_199 = arith.constant 0 : index
    %122 = vector.load %arg4[%c0_198, %c0_199] : memref<8x1xf32, #tpu.memory_space<vmem>>, vector<8x1xf32>
    %123 = vector.broadcast %122 : vector<8x1xf32> to vector<8x256xf32>
    %124 = arith.addf %121, %123 : vector<8x256xf32>
    %cst_200 = arith.constant 0.000000e+00 : f32
    %125 = vector.broadcast %cst_200 : f32 to vector<8x256xf32>
    %126 = arith.maximumf %124, %125 : vector<8x256xf32>
    %c0_201 = arith.constant 0 : index
    %c0_202 = arith.constant 0 : index
    %127 = vector.load %arg5[%c0_201, %c0_202] : memref<8x256xf32, #tpu.memory_space<vmem>>, vector<8x256xf32>
    tpu.vector_store %arg5[%c0_201, %c0_202], %126 {strides = array<i32>} : memref<8x256xf32, #tpu.memory_space<vmem>>, vector<8x256xf32>,
    return
  }
  func.func @transform_0(%arg0: i32) -> (i32, i32) {
    %c0_i32 = arith.constant 0 : i32
    %c0_i32_0 = arith.constant 0 : i32
    return %c0_i32, %arg0 : i32, i32
  }
  func.func @transform_1(%arg0: i32) -> (i32, i32, i32) {
    %c0_i32 = arith.constant 0 : i32
    %c0_i32_0 = arith.constant 0 : i32
    %c0_i32_1 = arith.constant 0 : i32
    return %arg0, %c0_i32, %c0_i32_0 : i32, i32, i32
  }
  func.func @transform_2(%arg0: i32) -> (i32, i32) {
    %c0_i32 = arith.constant 0 : i32
    %c0_i32_0 = arith.constant 0 : i32
    %c0_i32_1 = arith.constant 0 : i32
    return %c0_i32, %c0_i32_0 : i32, i32
  }
  func.func @transform_3(%arg0: i32) -> (i32, i32) {
    %c0_i32 = arith.constant 0 : i32
    %c0_i32_0 = arith.constant 0 : i32
    %c0_i32_1 = arith.constant 0 : i32
    return %c0_i32, %c0_i32_0 : i32, i32
  }
  func.func @transform_4(%arg0: i32) -> (i32, i32) {
    %c0_i32 = arith.constant 0 : i32
    %c0_i32_0 = arith.constant 0 : i32
    return %c0_i32, %arg0 : i32, i32
  }
}

</mosaic_0001>

<bundles_post_ra>
// kernel: tpu_custom_call.1
= control target key start
LH: loop header
LB: loop body
LE: loop exit
PB: predicated region body
PF: predicated region fallthrough
CT: control target
= control target key end

     0   :  { %9 = vsyncpa [#allocation6], 0  ;;  %s886_s0 = inlined_call_operand.hbm [shape: bf16[16,512], index: 0, kind: input, shape index: {}]   ;;  %s887_s1 = inlined_call_operand.vmem [shape: bf16[1,16,10], index: 1, kind: input, shape index: {}]   ;;  %s888_s2 = inlined_call_operand.vmem [shape: f32[8,36], index: 2, kind: input, shape index: {}]   ;;  %s889_s3 = inlined_call_operand.vmem [shape: f32[8,1], index: 3, kind: input, shape index: {}]   ;;  %s890_s4 = inlined_call_operand.hbm [shape: f32[8,256], index: 4, kind: output, shape index: {}]  }
   0x1   :  { %10 = vsyncpa [#allocation7], 0  ;;  %s655_s15 = smov [#allocation5]   ;;  %s607_s19 = scalar_lea.hbm %s886_s0, 256 }
   0x2   :  { %s16_s16 = sshll.u32 %s655_s15, 4  ;;  %p608_p0 = scmp.ne.s32.totalorder %s886_s0, %s607_s19  ;;  %s17_s16 = int_to_ptr.vmem [resolvable:$true] %s16_s16 }
   0x3   :  { %s609_s24 = scalar_lea.hbm %s886_s0, 512  ;;  %p611_p2 = scmp.lt.u32.totalorder %s607_s19, %s886_s0 }
   0x4   :  { %p610_p1 = scmp.lt.u32.totalorder %s609_s24, %s607_s19 }
   0x6   :  { %p612_p3 = por %p611_p2, %p610_p1 }
   0x8   :  { %p613_p4 = pnand %p612_p3, %p608_p0 }
   0xa   :  { %616 = shalt.err (!%p613_p4)
}
   0xb   :  { %s617_s27 = scalar_lea.vmem %s17_s16, 256  ;;  %p622_p6 = scmp.lt.s32.totalorder %s17_s16, %s17_s16 }
   0xc   :  { %p618_p5 = scmp.ne.s32.totalorder %s17_s16, %s617_s27  ;;  %p623_p7 = scmp.lt.s32.totalorder %s617_s27, %s617_s27 }
   0xe   :  { %p624_p8 = por %p623_p7, %p622_p6 }
  0x10   :  { %p625_p9 = pnand %p624_p8, %p618_p5 }
  0x12   :  { %628 = shalt.err (!%p625_p9)
}
  0x13   :  { %s656_s28 = smov 256   ;;  %s657_s29 = smov 128  }
  0x14   :  { %s658_s30 = smov 8  }
  0x15   :  { %22 = dma.hbm_to_vmem [thread:$0]  %s886_s0, 256, %s17_s16, [#allocation6], %s656_s28, %s657_s29, %s658_s30  }
  0x16   :  { %651 = dma.done.wait [#allocation6], 256  }
  0x17   :  { %652 = vsyncadd [#allocation6], 4294967040  ;;  %v32_v0 = vld [vmem:[#allocation5] sm:$0xff]  ;;  %vm46_vm0 = vcmask 80896   ;;  %v33_v2 = vld [vmem:[#allocation5 + $0x8] sm:$0xff]  ;;  %s659_s0 = smov 127   ;;  %v50_v17 = vlaneseq }
  0x18   :  { %v585_v1 = vld [vmem:[%s887_s1] sm:$0xff]   ;;  %v34_v3 = vunpack.c.l.bf16 %v32_v0  ;;  %v35_v4 = vunpack.c.h.bf16 %v32_v0  ;;  %v36_v6 = vunpack.c.l.bf16 %v33_v2  ;;  %v37_v7 = vunpack.c.h.bf16 %v33_v2  ;;  %s660_s1 = smov 119   ;;  %s661_s9 = smov 118  }
  0x19   :  { %v586_v5 = vunpack.c.l.bf16 %v585_v1  ;;  %v587_v8 = vunpack.c.h.bf16 %v585_v1  ;;  %vm717_vm1 = vcmp.lt.s32.totalorder %v50_v17, 256  ;;  %vm96_vm2 = vcmask 1039360   ;;  %s664_s13 = smov [#allocation8]  }
  0x1a   :  { %38 = vst [vmem:[#allocation2] sm:$0xff] %v34_v3  ;;  %39 = vst [vmem:[#allocation2 + $0x8] sm:$0xff] %v35_v4  ;;  %v662_v3 = vmov 0.0   ;;  %v663_v4 = vmov 0   ;;  %vm781_vm3 = vcmp.lt.s32.totalorder %v50_v17, 255  ;;  %vm109_vm4 = vcmask 1041400  }
  0x1b   :  { %47 = vst.msk [vmem:[#allocation3] sm:$0xff] %vm46_vm0, %v586_v5  ;;  %40 = vst [vmem:[#allocation2 + $0x10] sm:$0xff] %v36_v6  ;;  %555 = vmatprep.mubr.f32.mxu0 %v662_v3  ;;  %606 = vset.pattern.permute.xlu0 %v663_v4  ;;  %v474_v5 = vld [vmem:[%s889_s3] sm:$0xff]  ;;  %vm268_vm5 = vcmask 973824   ;;  %vm814_vm6 = vcmp.lt.s32.totalorder %v50_v17, 247  ;;  %vm281_vm7 = vcmask 1041336  }
  0x1c   :  { %41 = vst [vmem:[#allocation2 + $0x18] sm:$0xff] %v37_v7  ;;  %48 = vst.msk [vmem:[#allocation3 + $0x8] sm:$0xff] %vm46_vm0, %v587_v8  ;;  %vm400_vm8 = vcmask 965632   ;;  %vm855_vm9 = vcmp.lt.s32.totalorder %v50_v17, 246  ;;  %vm413_vm10 = vcmask 1041328   ;;  %vm484_vm11 = vcmask 1043456  }
  0x1d   :  { %vm480_vm12 = vcmask 293888   ;;  %s572_s14 = sshll.u32 %s664_s13, 4  ;;  %s573_s14 = int_to_ptr.vmem [resolvable:$true] %s572_s14 }
  0x1e   :  { %s629_s15 = scalar_lea.vmem %s573_s14, 256  ;;  %p634_p11 = scmp.lt.s32.totalorder %s573_s14, %s573_s14 }
  0x1f   :  { %p630_p10 = scmp.ne.s32.totalorder %s573_s14, %s629_s15  ;;  %p635_p12 = scmp.lt.s32.totalorder %s629_s15, %s629_s15 }
  0x21   :  { %v127_v9 = vld [vmem:[#allocation2 + $0x2] ss:$8 sm:$0x3]  ;;  %v91_v10 = vld [vmem:[#allocation2] ss:$8 sm:$0x3]  ;;  %p636_p13 = por %p635_p12, %p634_p11 }
  0x22   :  { %129 = vrot.lane.b32.xlu1 %v127_v9, %s659_s0  ;;  %93 = vrot.lane.b32.xlu0 %v91_v10, %s659_s0  ;;  %v143_v11 = vld [vmem:[#allocation2 + $0x3] ss:$8 sm:$0x3]  ;;  %v111_v12 = vld [vmem:[#allocation2 + $0x1] ss:$8 sm:$0x3] }
  0x23   :  { %v121_v13 = vld [vmem:[#allocation3 + $0x1] sm:$0x1]  ;;  %v104_v14 = vld [vmem:[#allocation3] sm:$0x1]  ;;  %v153_v15 = vld [vmem:[#allocation3 + $0x3] sm:$0x1]  ;;  %p637_p0 = pnand %p636_p13, %p630_p10 }
  0x24   :  { %v137_v16 = vld [vmem:[#allocation3 + $0x2] sm:$0x1]  ;;  %v215_v18 = vld [vmem:[#allocation2 + $0x11] ss:$8 sm:$0x3] }
  0x25   :  { %v199_v19 = vld [vmem:[#allocation2 + $0x10] ss:$8 sm:$0x3]  ;;  %v247_v21 = vld [vmem:[#allocation2 + $0x13] ss:$8 sm:$0x3] }
  0x26   :  { %145 = vrot.lane.b32.xlu1 %v143_v11, %s659_s0  ;;  %113 = vrot.lane.b32.xlu0 %v111_v12, %s659_s0  ;;  %v231_v22 = vld [vmem:[#allocation2 + $0x12] ss:$8 sm:$0x3]  ;;  %v49_v23 = vld [vmem:[#allocation2] ss:$8 sm:$0x3] }
  0x27   :  { %v57_v24 = vld [vmem:[#allocation2 + $0x1] ss:$8 sm:$0x3]  ;;  %54 = vst.msk [vmem:[#allocation4] ss:$8 sm:$0x3] %vm717_vm1, %v49_v23 }
  0x28   :  { %59 = vst.msk [vmem:[#allocation4 + $0x1] ss:$8 sm:$0x3] %vm717_vm1, %v57_v24  ;;  %v62_v25 = vld [vmem:[#allocation2 + $0x2] ss:$8 sm:$0x3] }
  0x29   :  { %v67_v26 = vld [vmem:[#allocation2 + $0x3] ss:$8 sm:$0x3]  ;;  %64 = vst.msk [vmem:[#allocation4 + $0x2] ss:$8 sm:$0x3] %vm717_vm1, %v62_v25 }
  0x2a   :  { %123 = vrot.lane.b32.xlu1 %v121_v13, %s659_s0  ;;  %106 = vrot.lane.b32.xlu0 %v104_v14, %s659_s0  ;;  %69 = vst.msk [vmem:[#allocation4 + $0x3] ss:$8 sm:$0x3] %vm717_vm1, %v67_v26  ;;  %v72_v27 = vld [vmem:[#allocation2 + $0x4] ss:$8 sm:$0x3] }
  0x2b   :  { %v77_v28 = vld [vmem:[#allocation2 + $0x5] ss:$8 sm:$0x3]  ;;  %v283_v29 = vld [vmem:[#allocation2 + $0x1] ss:$8 sm:$0x3] }
  0x2c   :  { %v263_v30 = vld [vmem:[#allocation2] ss:$8 sm:$0x3]  ;;  %74 = vst.msk [vmem:[#allocation4 + $0x4] ss:$8 sm:$0x3] %vm717_vm1, %v72_v27 }
  0x2d   :  { %79 = vst.msk [vmem:[#allocation4 + $0x5] ss:$8 sm:$0x3] %vm717_vm1, %v77_v28  ;;  %v82_v31 = vld [vmem:[#allocation2 + $0x6] ss:$8 sm:$0x3] }
  0x2e   :  { %155 = vrot.lane.b32.xlu1 %v153_v15, %s659_s0  ;;  %139 = vrot.lane.b32.xlu0 %v137_v16, %s659_s0  ;;  %v87_v32 = vld [vmem:[#allocation2 + $0x7] ss:$8 sm:$0x3]  ;;  %84 = vst.msk [vmem:[#allocation4 + $0x6] ss:$8 sm:$0x3] %vm717_vm1, %v82_v31 }
  0x2f   :  { %89 = vst.msk [vmem:[#allocation4 + $0x7] ss:$8 sm:$0x3] %vm717_vm1, %v87_v32  ;;  %v160_v33 = vld [vmem:[#allocation2 + $0x10] ss:$8 sm:$0x3] }
  0x30   :  { %v165_v34 = vld [vmem:[#allocation2 + $0x11] ss:$8 sm:$0x3]  ;;  %162 = vst.msk [vmem:[#allocation4 + $0x14] ss:$8 sm:$0x3] %vm717_vm1, %v160_v33 }
  0x31   :  { %167 = vst.msk [vmem:[#allocation4 + $0x15] ss:$8 sm:$0x3] %vm717_vm1, %v165_v34  ;;  %v170_v35 = vld [vmem:[#allocation2 + $0x12] ss:$8 sm:$0x3] }
  0x32   :  { %217 = vrot.lane.b32.xlu1 %v215_v18, %s659_s0  ;;  %201 = vrot.lane.b32.xlu0 %v199_v19, %s659_s0  ;;  %v175_v36 = vld [vmem:[#allocation2 + $0x13] ss:$8 sm:$0x3]  ;;  %172 = vst.msk [vmem:[#allocation4 + $0x16] ss:$8 sm:$0x3] %vm717_vm1, %v170_v35 }
  0x33   :  { %177 = vst.msk [vmem:[#allocation4 + $0x17] ss:$8 sm:$0x3] %vm717_vm1, %v175_v36  ;;  %v180_v37 = vld [vmem:[#allocation2 + $0x14] ss:$8 sm:$0x3] }
  0x34   :  { %182 = vst.msk [vmem:[#allocation4 + $0x20] ss:$8 sm:$0x3] %vm717_vm1, %v180_v37  ;;  %v185_v38 = vld [vmem:[#allocation2 + $0x15] ss:$8 sm:$0x3] }
  0x35   :  { %v190_v39 = vld [vmem:[#allocation2 + $0x16] ss:$8 sm:$0x3]  ;;  %187 = vst.msk [vmem:[#allocation4 + $0x21] ss:$8 sm:$0x3] %vm717_vm1, %v185_v38 }
  0x36   :  { %249 = vrot.lane.b32.xlu1 %v247_v21, %s659_s0  ;;  %233 = vrot.lane.b32.xlu0 %v231_v22, %s659_s0  ;;  %192 = vst.msk [vmem:[#allocation4 + $0x22] ss:$8 sm:$0x3] %vm717_vm1, %v190_v39  ;;  %v195_v40 = vld [vmem:[#allocation2 + $0x17] ss:$8 sm:$0x3] }
  0x37   :  { %v315_v41 = vld [vmem:[#allocation2 + $0x3] ss:$8 sm:$0x3]  ;;  %v299_v42 = vld [vmem:[#allocation2 + $0x2] ss:$8 sm:$0x3] }
  0x38   :  { %197 = vst.msk [vmem:[#allocation4 + $0x23] ss:$8 sm:$0x3] %vm717_vm1, %v195_v40  ;;  %v347_v43 = vld [vmem:[#allocation2 + $0x5] ss:$8 sm:$0x3] }
  0x39   :  { %v331_v44 = vld [vmem:[#allocation2 + $0x4] ss:$8 sm:$0x3]  ;;  %v379_v45 = vld [vmem:[#allocation2 + $0x7] ss:$8 sm:$0x3] }
  0x3a   :  { %285 = vrot.lane.b32.xlu1 %v283_v29, %s660_s1  ;;  %265 = vrot.lane.b32.xlu0 %v263_v30, %s660_s1  ;;  %v363_v46 = vld [vmem:[#allocation2 + $0x6] ss:$8 sm:$0x3]  ;;  %v225_v47 = vld [vmem:[#allocation3 + $0x9] sm:$0x1]  ;;  %v465_v28 = vld [vmem:[#allocation4 + $0x8] sm:$0xff] }
  0x3b   :  { %v209_v48 = vld [vmem:[#allocation3 + $0x8] sm:$0x1]  ;;  %v257_v49 = vld [vmem:[#allocation3 + $0xb] sm:$0x1]  ;;  %v241_v50 = vld [vmem:[#allocation3 + $0xa] sm:$0x1] }
  0x3c   :  { %v293_v51 = vld [vmem:[#allocation3 + $0x1] sm:$0x1]  ;;  %v276_v52 = vld [vmem:[#allocation3] sm:$0x1]  ;;  %v325_v53 = vld [vmem:[#allocation3 + $0x3] sm:$0x1] }
  0x3d   :  { %v309_v54 = vld [vmem:[#allocation3 + $0x2] sm:$0x1]  ;;  %v357_v55 = vld [vmem:[#allocation3 + $0x5] sm:$0x1]  ;;  %v341_v56 = vld [vmem:[#allocation3 + $0x4] sm:$0x1] }
  0x3e   :  { %317 = vrot.lane.b32.xlu1 %v315_v41, %s660_s1  ;;  %301 = vrot.lane.b32.xlu0 %v299_v42, %s660_s1  ;;  %v389_v57 = vld [vmem:[#allocation3 + $0x7] sm:$0x1]  ;;  %v373_v58 = vld [vmem:[#allocation3 + $0x6] sm:$0x1]  ;;  %v425_v63 = vld [vmem:[#allocation3 + $0x1] sm:$0x1] }
  0x3f   :  { %v415_v59 = vld [vmem:[#allocation2 + $0x1] ss:$8 sm:$0x3]  ;;  %v395_v60 = vld [vmem:[#allocation2] ss:$8 sm:$0x3] }
  0x40   :  { %v447_v61 = vld [vmem:[#allocation2 + $0x3] ss:$8 sm:$0x3]  ;;  %v431_v62 = vld [vmem:[#allocation2 + $0x2] ss:$8 sm:$0x3] }
  0x41   :  { %v408_v0 = vld [vmem:[#allocation3] sm:$0x1]  ;;  %v457_v1 = vld [vmem:[#allocation3 + $0x3] sm:$0x1]  ;;  %v441_v2 = vld [vmem:[#allocation3 + $0x2] sm:$0x1] }
  0x42   :  { %349 = vrot.lane.b32.xlu1 %v347_v43, %s660_s1  ;;  %333 = vrot.lane.b32.xlu0 %v331_v44, %s660_s1  ;;  %v464_v31 = vld [vmem:[#allocation4] sm:$0xff] }
  0x46   :  { %381 = vrot.lane.b32.xlu1 %v379_v45, %s660_s1  ;;  %365 = vrot.lane.b32.xlu0 %v363_v46, %s660_s1 }
  0x4a   :  { %227 = vrot.lane.b32.xlu1 %v225_v47, %s659_s0  ;;  %211 = vrot.lane.b32.xlu0 %v209_v48, %s659_s0 }
  0x4e   :  { %259 = vrot.lane.b32.xlu1 %v257_v49, %s659_s0  ;;  %243 = vrot.lane.b32.xlu0 %v241_v50, %s659_s0 }
  0x52   :  { %295 = vrot.lane.b32.xlu1 %v293_v51, %s660_s1  ;;  %278 = vrot.lane.b32.xlu0 %v276_v52, %s660_s1 }
  0x56   :  { %327 = vrot.lane.b32.xlu1 %v325_v53, %s660_s1  ;;  %311 = vrot.lane.b32.xlu0 %v309_v54, %s660_s1 }
  0x5a   :  { %359 = vrot.lane.b32.xlu1 %v357_v55, %s660_s1  ;;  %343 = vrot.lane.b32.xlu0 %v341_v56, %s660_s1 }
  0x5e   :  { %391 = vrot.lane.b32.xlu1 %v389_v57, %s660_s1  ;;  %375 = vrot.lane.b32.xlu0 %v373_v58, %s660_s1 }
  0x62   :  { %417 = vrot.lane.b32.xlu1 %v415_v59, %s661_s9  ;;  %397 = vrot.lane.b32.xlu0 %v395_v60, %s661_s9 }
  0x66   :  { %449 = vrot.lane.b32.xlu1 %v447_v61, %s661_s9  ;;  %433 = vrot.lane.b32.xlu0 %v431_v62, %s661_s9 }
  0x6a   :  { %427 = vrot.lane.b32.xlu1 %v425_v63, %s661_s9  ;;  %410 = vrot.lane.b32.xlu0 %v408_v0, %s661_s9 }
  0x6e   :  { %459 = vrot.lane.b32.xlu1 %v457_v1, %s661_s9  ;;  %443 = vrot.lane.b32.xlu0 %v441_v2, %s661_s9 }
  0x72   :  { %477 = vperm.xlu0 %606, %v474_v5  }
  0x94   :  { %v130_v6 = vpop.permute.xlu1 %129  ;;  %v94_v7 = vpop.permute.xlu0 %93 }
  0x95   :  { %v131_v9 = vrot.slane %v130_v6, 1  ;;  %v95_v10 = vrot.slane %v94_v7, 1 }
  0x97   :  { %v132_v11 = vsel %vm96_vm2, %v130_v6, %v131_v9  ;;  %v97_v12 = vsel %vm96_vm2, %v94_v7, %v95_v10 }
  0x98   :  { %135 = vst.msk [vmem:[#allocation4 + $0x12] ss:$8 sm:$0x3] %vm781_vm3, %v132_v11  ;;  %102 = vst.msk [vmem:[#allocation4 + $0x10] ss:$8 sm:$0x3] %vm781_vm3, %v97_v12  ;;  %v146_v13 = vpop.permute.xlu1 %145  ;;  %v114_v14 = vpop.permute.xlu0 %113 }
  0x99   :  { %v147_v15 = vrot.slane %v146_v13, 1  ;;  %v115_v16 = vrot.slane %v114_v14, 1 }
  0x9b   :  { %v148_v18 = vsel %vm96_vm2, %v146_v13, %v147_v15  ;;  %v116_v19 = vsel %vm96_vm2, %v114_v14, %v115_v16 }
  0x9c   :  { %151 = vst.msk [vmem:[#allocation4 + $0x13] ss:$8 sm:$0x3] %vm781_vm3, %v148_v18  ;;  %119 = vst.msk [vmem:[#allocation4 + $0x11] ss:$8 sm:$0x3] %vm781_vm3, %v116_v19  ;;  %v124_v20 = vpop.permute.xlu1 %123  ;;  %v107_v21 = vpop.permute.xlu0 %106 }
  0x9d   :  { %126 = vst.msk [vmem:[#allocation4 + $0x19] sm:$0x1] %vm109_vm4, %v124_v20  ;;  %110 = vst.msk [vmem:[#allocation4 + $0x18] sm:$0x1] %vm109_vm4, %v107_v21 }
  0xa0   :  { %v156_v22 = vpop.permute.xlu1 %155  ;;  %v140_v23 = vpop.permute.xlu0 %139 }
  0xa1   :  { %158 = vst.msk [vmem:[#allocation4 + $0x1b] sm:$0x1] %vm109_vm4, %v156_v22  ;;  %142 = vst.msk [vmem:[#allocation4 + $0x1a] sm:$0x1] %vm109_vm4, %v140_v23 }
  0xa3   :  { %v466_v32 = vld [vmem:[#allocation4 + $0x10] sm:$0xff] }
  0xa4   :  { %v218_v24 = vpop.permute.xlu1 %217  ;;  %v202_v25 = vpop.permute.xlu0 %201  ;;  %v590_v39 = vpack.c.bf16 %v466_v32, %v464_v31 }
  0xa5   :  { %v219_v26 = vrot.slane %v218_v24, 1  ;;  %v203_v27 = vrot.slane %v202_v25, 1 }
  0xa7   :  { %v220_v29 = vsel %vm96_vm2, %v218_v24, %v219_v26  ;;  %v204_v30 = vsel %vm96_vm2, %v202_v25, %v203_v27 }
  0xa8   :  { %223 = vst.msk [vmem:[#allocation4 + $0x25] ss:$8 sm:$0x3] %vm781_vm3, %v220_v29  ;;  %207 = vst.msk [vmem:[#allocation4 + $0x24] ss:$8 sm:$0x3] %vm781_vm3, %v204_v30  ;;  %v250_v33 = vpop.permute.xlu1 %249  ;;  %v234_v34 = vpop.permute.xlu0 %233 }
  0xa9   :  { %v467_v35 = vld [vmem:[#allocation4 + $0x18] sm:$0xff]  ;;  %v251_v36 = vrot.slane %v250_v33, 1  ;;  %v235_v37 = vrot.slane %v234_v34, 1 }
  0xaa   :  { %v588_v38 = vpack.c.bf16 %v467_v35, %v465_v28 }
  0xab   :  { %v252_v40 = vsel %vm96_vm2, %v250_v33, %v251_v36  ;;  %v236_v41 = vsel %vm96_vm2, %v234_v34, %v235_v37 }
  0xac   :  { %589 = vmatprep.subr.bf16.mxu0 %v588_v38  ;;  %255 = vst.msk [vmem:[#allocation4 + $0x27] ss:$8 sm:$0x3] %vm781_vm3, %v252_v40  ;;  %239 = vst.msk [vmem:[#allocation4 + $0x26] ss:$8 sm:$0x3] %vm781_vm3, %v236_v41  ;;  %v286_v42 = vpop.permute.xlu1 %285  ;;  %v266_v43 = vpop.permute.xlu0 %265 }
  0xad   :  { %591 = vmatpush1.bf16.msra.mxu0 %v590_v39  ;;  %v287_v45 = vrot.slane %v286_v42, 1  ;;  %v267_v46 = vrot.slane %v266_v43, 1  ;;  %v463_v39 = vld [vmem:[%s888_s2] sm:$0xff] }
  0xaf   :  { %v288_v47 = vsel %vm268_vm5, %v286_v42, %v287_v45  ;;  %v269_v48 = vsel %vm268_vm5, %v266_v43, %v267_v46 }
  0xb0   :  { %291 = vst.msk [vmem:[#allocation4 + $0x31] ss:$8 sm:$0x3] %vm814_vm6, %v288_v47  ;;  %274 = vst.msk [vmem:[#allocation4 + $0x30] ss:$8 sm:$0x3] %vm814_vm6, %v269_v48  ;;  %v318_v49 = vpop.permute.xlu1 %317  ;;  %v302_v50 = vpop.permute.xlu0 %301 }
  0xb1   :  { %v319_v51 = vrot.slane %v318_v49, 1  ;;  %v303_v52 = vrot.slane %v302_v50, 1 }
  0xb3   :  { %v320_v53 = vsel %vm268_vm5, %v318_v49, %v319_v51  ;;  %v304_v54 = vsel %vm268_vm5, %v302_v50, %v303_v52  ;;  %v468_v30 = vld [vmem:[#allocation4 + $0x20] sm:$0xff] }
  0xb4   :  { %323 = vst.msk [vmem:[#allocation4 + $0x33] ss:$8 sm:$0x3] %vm814_vm6, %v320_v53  ;;  %307 = vst.msk [vmem:[#allocation4 + $0x32] ss:$8 sm:$0x3] %vm814_vm6, %v304_v54  ;;  %v350_v55 = vpop.permute.xlu1 %349  ;;  %v334_v56 = vpop.permute.xlu0 %333 }
  0xb5   :  { %v351_v57 = vrot.slane %v350_v55, 1  ;;  %v335_v58 = vrot.slane %v334_v56, 1 }
  0xb7   :  { %v352_v59 = vsel %vm268_vm5, %v350_v55, %v351_v57  ;;  %v336_v60 = vsel %vm268_vm5, %v334_v56, %v335_v58 }
  0xb8   :  { %355 = vst.msk [vmem:[#allocation4 + $0x35] ss:$8 sm:$0x3] %vm814_vm6, %v352_v59  ;;  %339 = vst.msk [vmem:[#allocation4 + $0x34] ss:$8 sm:$0x3] %vm814_vm6, %v336_v60  ;;  %v382_v61 = vpop.permute.xlu1 %381  ;;  %v366_v62 = vpop.permute.xlu0 %365 }
  0xb9   :  { %v383_v63 = vrot.slane %v382_v61, 1  ;;  %v367_v0 = vrot.slane %v366_v62, 1 }
  0xbb   :  { %v384_v1 = vsel %vm268_vm5, %v382_v61, %v383_v63  ;;  %v368_v2 = vsel %vm268_vm5, %v366_v62, %v367_v0 }
  0xbc   :  { %387 = vst.msk [vmem:[#allocation4 + $0x37] ss:$8 sm:$0x3] %vm814_vm6, %v384_v1  ;;  %371 = vst.msk [vmem:[#allocation4 + $0x36] ss:$8 sm:$0x3] %vm814_vm6, %v368_v2  ;;  %v228_v3 = vpop.permute.xlu1 %227  ;;  %v212_v4 = vpop.permute.xlu0 %211 }
  0xbd   :  { %230 = vst.msk [vmem:[#allocation4 + $0x2d] sm:$0x1] %vm109_vm4, %v228_v3  ;;  %214 = vst.msk [vmem:[#allocation4 + $0x2c] sm:$0x1] %vm109_vm4, %v212_v4 }
  0xc0   :  { %v260_v5 = vpop.permute.xlu1 %259  ;;  %v244_v6 = vpop.permute.xlu0 %243 }
  0xc1   :  { %262 = vst.msk [vmem:[#allocation4 + $0x2f] sm:$0x1] %vm109_vm4, %v260_v5  ;;  %246 = vst.msk [vmem:[#allocation4 + $0x2e] sm:$0x1] %vm109_vm4, %v244_v6 }
  0xc3   :  { %v470_v23 = vld [vmem:[#allocation4 + $0x30] sm:$0xff] }
  0xc4   :  { %v296_v7 = vpop.permute.xlu1 %295  ;;  %v279_v8 = vpop.permute.xlu0 %278  ;;  %v594_v31 = vpack.c.bf16 %v470_v23, %v468_v30 }
  0xc5   :  { %298 = vst.msk [vmem:[#allocation4 + $0x39] sm:$0x1] %vm281_vm7, %v296_v7  ;;  %282 = vst.msk [vmem:[#allocation4 + $0x38] sm:$0x1] %vm281_vm7, %v279_v8 }
  0xc8   :  { %v328_v9 = vpop.permute.xlu1 %327  ;;  %v312_v10 = vpop.permute.xlu0 %311  ;;  %v469_v26 = vld [vmem:[#allocation4 + $0x28] sm:$0xff] }
  0xc9   :  { %330 = vst.msk [vmem:[#allocation4 + $0x3b] sm:$0x1] %vm281_vm7, %v328_v9  ;;  %314 = vst.msk [vmem:[#allocation4 + $0x3a] sm:$0x1] %vm281_vm7, %v312_v10 }
  0xcc   :  { %v360_v11 = vpop.permute.xlu1 %359  ;;  %v344_v12 = vpop.permute.xlu0 %343 }
  0xcd   :  { %362 = vst.msk [vmem:[#allocation4 + $0x3d] sm:$0x1] %vm281_vm7, %v360_v11  ;;  %346 = vst.msk [vmem:[#allocation4 + $0x3c] sm:$0x1] %vm281_vm7, %v344_v12 }
  0xd0   :  { %v392_v13 = vpop.permute.xlu1 %391  ;;  %v376_v14 = vpop.permute.xlu0 %375 }
  0xd1   :  { %394 = vst.msk [vmem:[#allocation4 + $0x3f] sm:$0x1] %vm281_vm7, %v392_v13  ;;  %378 = vst.msk [vmem:[#allocation4 + $0x3e] sm:$0x1] %vm281_vm7, %v376_v14 }
  0xd4   :  { %v418_v15 = vpop.permute.xlu1 %417  ;;  %v398_v16 = vpop.permute.xlu0 %397 }
  0xd5   :  { %v419_v19 = vrot.slane %v418_v15, 1  ;;  %v399_v20 = vrot.slane %v398_v16, 1 }
  0xd7   :  { %v420_v21 = vsel %vm400_vm8, %v418_v15, %v419_v19  ;;  %v401_v22 = vsel %vm400_vm8, %v398_v16, %v399_v20 }
  0xd8   :  { %423 = vst.msk [vmem:[#allocation4 + $0x41] ss:$8 sm:$0x3] %vm855_vm9, %v420_v21  ;;  %406 = vst.msk [vmem:[#allocation4 + $0x40] ss:$8 sm:$0x3] %vm855_vm9, %v401_v22  ;;  %v450_v24 = vpop.permute.xlu1 %449  ;;  %v434_v25 = vpop.permute.xlu0 %433 }
  0xd9   :  { %v471_v17 = vld [vmem:[#allocation4 + $0x38] sm:$0xff]  ;;  %v451_v27 = vrot.slane %v450_v24, 1  ;;  %v435_v28 = vrot.slane %v434_v25, 1 }
  0xda   :  { %v592_v29 = vpack.c.bf16 %v471_v17, %v469_v26 }
  0xdb   :  { %v452_v32 = vsel %vm400_vm8, %v450_v24, %v451_v27  ;;  %v436_v33 = vsel %vm400_vm8, %v434_v25, %v435_v28 }
  0xdc   :  { %593 = vmatprep.subr.bf16.mxu0 %v592_v29  ;;  %455 = vst.msk [vmem:[#allocation4 + $0x43] ss:$8 sm:$0x3] %vm855_vm9, %v452_v32  ;;  %439 = vst.msk [vmem:[#allocation4 + $0x42] ss:$8 sm:$0x3] %vm855_vm9, %v436_v33  ;;  %v428_v34 = vpop.permute.xlu1 %427  ;;  %v411_v35 = vpop.permute.xlu0 %410 }
  0xdd   :  { %595 = vmatpush1.bf16.msra.mxu0 %v594_v31  ;;  %430 = vst.msk [vmem:[#allocation4 + $0x49] sm:$0x1] %vm413_vm10, %v428_v34  ;;  %414 = vst.msk [vmem:[#allocation4 + $0x48] sm:$0x1] %vm413_vm10, %v411_v35 }
  0xe0   :  { %v460_v36 = vpop.permute.xlu1 %459  ;;  %v444_v37 = vpop.permute.xlu0 %443 }
  0xe1   :  { %462 = vst.msk [vmem:[#allocation4 + $0x4b] sm:$0x1] %vm413_vm10, %v460_v36  ;;  %446 = vst.msk [vmem:[#allocation4 + $0x4a] sm:$0x1] %vm413_vm10, %v444_v37 }
  0xe3   :  { %v472_v40 = vld [vmem:[#allocation4 + $0x40] sm:$0xf] }
  0xe8   :  { %v473_v38 = vld [vmem:[#allocation4 + $0x48] sm:$0xf] }
  0xe9   :  { %581 = vmatprep.subr.msk.mxu0 %vm484_vm11, %v473_v38 }
  0xea   :  { %582 = vmatpush1.msk.msra.mxu0 %vm484_vm11, %v472_v40 }
  0xeb   :  { %583 = vmatmul.mubr.msk.f32.vlgmr.msra.gmra.mrb[0].mxu0 %vm480_vm12, %v463_v39 }
  0xf1   :  { %v478_v41 = vpop.permute.xlu0 %477 }
 0x1be   :  { %v557_v42 = vpop.f32.mrb[0].mxu0 }
 0x1bf   :  { %v558_v43 = vadd.f32 %v557_v42, %v478_v41  ;;  %v559_v44 = vpop.f32.mrb[1].mxu0 }
 0x1c0   :  { %v560_v45 = vadd.f32 %v559_v44, %v478_v41 }
 0x1c1   :  { %v562_v46 = vmax.f32 %v558_v43, 0.0 }
 0x1c2   :  { %v563_v47 = vmax.f32 %v560_v45, 0.0 }
 0x1c3   :  { %564 = vst [vmem:[#allocation8] sm:$0xff] %v562_v46 }
 0x1c4   :  { %565 = vst [vmem:[#allocation8 + $0x8] sm:$0xff] %v563_v47 }
 0x1c5   :  { %640 = shalt.err (!%p637_p0)
}
 0x1c6   :  { %s641_s17 = scalar_lea.hbm %s890_s4, 256 }
 0x1c7   :  { %p642_p1 = scmp.ne.s32.totalorder %s890_s4, %s641_s17  ;;  %p645_p2 = scmp.lt.u32.totalorder %s641_s17, %s890_s4 }
 0x1c9   :  { %p647_p3 = pnand %p645_p2, %p642_p1 }
 0x1cb   :  { %650 = shalt.err (!%p647_p3)
}
 0x1cc   :  { %575 = dma.vmem_to_hbm [thread:$0]  %s573_s14, 256, %s890_s4, [#allocation7]  }
 0x1cd   :  { %653 = dma.done.wait [#allocation7], 256  }
 0x1ce   :  { %654 = vsyncadd [#allocation7], 4294967040 }
 0x1cf   :  { %579 = vsyncpa [#allocation6], 1 }
 0x1d0   :  { %580 = vsyncpa [#allocation7], 1 }

</bundles_post_ra>
